<compile_context>
chip_gen: v7x
topology: tpu7x:2x2x1
jax: 0.10.0
libtpu: 0.0.40
codegen_flags: <defaults>
</compile_context>

<pallas_src>
import functools

import jax
import jax.numpy as jnp
from jax import lax
from jax.experimental import pallas as pl
from jax.experimental.pallas import tpu as pltpu

GAMMA = 2.0
_SUBLANES = 8
_LANES = 128


def _round_up(x, m):
    return ((x + m - 1) // m) * m


def _focal_loss_tile_kernel(n_valid, logits_ref, targets_ref, out_ref):
    """One row-tile: CE + focal modulation, emits a lane-dense partial sum."""
    pid = pl.program_id(0)
    x = logits_ref[...].astype(jnp.float32)                # (T, C) f32 compute
    t = targets_ref[...]                                   # (T, 1) int32
    tile_rows = x.shape[0]

    # Global row index -> mask rows that are only padding.
    row = pid * tile_rows + lax.broadcasted_iota(jnp.int32, (tile_rows, 1), 0)
    valid = row < n_valid

    # Single exp pass, reused for log-sum-exp and the target probability.
    m = jnp.max(x, axis=-1, keepdims=True)                 # (T, 1)
    e = jnp.exp(x - m)                                     # (T, C)  EUP
    sumexp = jnp.sum(e, axis=-1, keepdims=True)            # (T, 1)

    cls = lax.broadcasted_iota(jnp.int32, x.shape, 1)      # (T, C)
    tgt_mask = cls == t
    tgt_logit = jnp.sum(jnp.where(tgt_mask, x, 0.0), axis=-1, keepdims=True)
    tgt_exp = jnp.sum(jnp.where(tgt_mask, e, 0.0), axis=-1, keepdims=True)

    ce = jnp.log(sumexp) + m - tgt_logit                   # per-sample CE
    pt = tgt_exp / sumexp                                  # softmax prob of target
    one_minus_pt = 1.0 - pt
    focal = one_minus_pt * one_minus_pt * ce               # gamma == 2 -> square

    partial = jnp.sum(jnp.where(valid, focal, 0.0))
    # Lane-dense (1, 8, 128) slab -> unmasked store; lane [0, 0] read outside.
    out_ref[...] = jnp.full(out_ref.shape, partial, dtype=jnp.float32)


def focal_loss(logits, targets, gamma=2.0, reduction="mean", tile_n=256):
    """logits: (N, C) f32/bf16; targets: (N,) int class indices."""
    assert gamma == GAMMA, "kernel specialized for gamma=2"
    assert reduction in ("mean", "sum")
    n, c = logits.shape

    # Row tile: multiple of 8 sublanes, never larger than needed.
    tile = _round_up(min(int(tile_n), _round_up(n, _SUBLANES)), _SUBLANES)
    n_pad = _round_up(n, tile)
    num_tiles = n_pad // tile

    if n_pad != n:
        logits = jnp.pad(logits, ((0, n_pad - n), (0, 0)))
        targets = jnp.pad(targets, (0, n_pad - n))
    targets2d = targets.astype(jnp.int32).reshape(n_pad, 1)

    itemsize = jnp.dtype(logits.dtype).itemsize
    block_bytes = tile * c * itemsize
    # double-buffered logits + lane-padded targets + output slabs, with headroom
    est = 2 * block_bytes + 2 * tile * _LANES * 4 + 2 * _SUBLANES * _LANES * 4
    vmem_limit = int(min(max(3 * est, 16 << 20), 32 << 20))

    cost = pl.CostEstimate(
        flops=8 * n_pad * c,
        transcendentals=n_pad * c,
        bytes_accessed=n_pad * c * itemsize + n_pad * 4
        + num_tiles * _SUBLANES * _LANES * 4,
    )

    partials = pl.pallas_call(
        functools.partial(_focal_loss_tile_kernel, n),
        out_shape=jax.ShapeDtypeStruct((num_tiles, _SUBLANES, _LANES), jnp.float32),
        grid_spec=pltpu.PrefetchScalarGridSpec(
            num_scalar_prefetch=0,
            grid=(num_tiles,),
            in_specs=[
                pl.BlockSpec((tile, c), lambda i: (i, 0)),
                pl.BlockSpec((tile, 1), lambda i: (i, 0)),
            ],
            out_specs=pl.BlockSpec((1, _SUBLANES, _LANES), lambda i: (i, 0, 0)),
        ),
        compiler_params=pltpu.CompilerParams(
            dimension_semantics=("parallel",),
            vmem_limit_bytes=vmem_limit,
        ),
        cost_estimate=cost,
    )(logits, targets2d)

    total = jnp.sum(partials[:, 0, 0])
    if reduction == "mean":
        return total / jnp.float32(n)
    return total


if __name__ == "__main__":
    key = jax.random.PRNGKey(0)

    def reference(lg, tg):
        lg = lg.astype(jnp.float32)
        logp = jax.nn.log_softmax(lg, axis=-1)
        ce = -jnp.take_along_axis(logp, tg[:, None].astype(jnp.int32), axis=-1)[:, 0]
        pt = jnp.exp(-ce)
        return jnp.mean((1.0 - pt) ** GAMMA * ce)

    # 1) small shapes consistent with the module: batch=8, classes=32
    k1, k2 = jax.random.split(key)
    N, C = 8, 32
    logits = jax.random.normal(k1, (N, C), dtype=jnp.float32)
    targets = jax.random.randint(k2, (N,), 0, C, dtype=jnp.int32)
    out = focal_loss(logits, targets)
    jax.block_until_ready(out)
    ref = reference(logits, targets)
    assert jnp.allclose(out, ref, rtol=1e-5, atol=1e-5), (out, ref)

    # 2) multi-tile + ragged N (exercises padded-row masking and pipelining)
    k3, k4 = jax.random.split(k2)
    N2, C2 = 200, 128
    logits2 = jax.random.normal(k3, (N2, C2), dtype=jnp.float32)
    targets2 = jax.random.randint(k4, (N2,), 0, C2, dtype=jnp.int32)
    out2 = focal_loss(logits2, targets2, tile_n=64)
    jax.block_until_ready(out2)
    ref2 = reference(logits2, targets2)
    assert jnp.allclose(out2, ref2, rtol=1e-5, atol=1e-5), (out2, ref2)

    # 3) bf16 logits (half the HBM traffic; f32 compute inside the kernel)
    logits3 = logits2.astype(jnp.bfloat16)
    out3 = focal_loss(logits3, targets2, tile_n=64)
    jax.block_until_ready(out3)
    ref3 = reference(logits3, targets2)
    assert jnp.allclose(out3, ref3, rtol=1e-5, atol=1e-5), (out3, ref3)

    print("KERNEL_OK")
</pallas_src>

<mosaic_0001>
module attributes {stable_mosaic.version = 11 : i64} {
  func.func @_focal_loss_tile_kernel(%arg0: i32, %arg1: memref<8x32xf32, #tpu.memory_space<vmem>>, %arg2: memref<8x1xi32, #tpu.memory_space<vmem>>, %arg3: memref<1x8x128xf32, #tpu.memory_space<vmem>>) attributes {dimension_semantics = [#tpu.dimension_semantics<parallel>], iteration_bounds = array<i64: 1>, scalar_prefetch = 0 : i64, scratch_operands = 0 : i64, tpu.core_type = #tpu.core_type<tc>, window_params = [{transform_indices = @transform_0, window_bounds = array<i64: 8, 32>}, {transform_indices = @transform_1, window_bounds = array<i64: 8, 1>}, {transform_indices = @transform_2, window_bounds = array<i64: 1, 8, 128>}]} {
    %c0 = arith.constant 0 : index
    %c0_0 = arith.constant 0 : index
    %0 = vector.load %arg1[%c0, %c0_0] : memref<8x32xf32, #tpu.memory_space<vmem>>, vector<8x32xf32>
    %c0_1 = arith.constant 0 : index
    %c0_2 = arith.constant 0 : index
    %1 = vector.load %arg2[%c0_1, %c0_2] : memref<8x1xi32, #tpu.memory_space<vmem>>, vector<8x1xi32>
    %c8_i32 = arith.constant 8 : i32
    %2 = arith.muli %arg0, %c8_i32 : i32
    %3 = tpu.iota {dimensions = array<i32: 0>} : vector<8x1xi32>
    %4 = vector.broadcast %2 : i32 to vector<8x1xi32>
    %5 = arith.addi %4, %3 : vector<8x1xi32>
    %c8_i32_3 = arith.constant 8 : i32
    %6 = vector.broadcast %c8_i32_3 : i32 to vector<8x1xi32>
    %7 = arith.cmpi slt, %5, %6 : vector<8x1xi32>
    %cst = arith.constant dense<0xFF800000> : vector<8xf32>
    %8 = vector.multi_reduction <maximumf>, %0, %cst [1] : vector<8x32xf32> to vector<8xf32>
    %9 = vector.shape_cast %8 : vector<8xf32> to vector<8x1xf32>
    %10 = vector.broadcast %9 : vector<8x1xf32> to vector<8x32xf32>
    %11 = arith.subf %0, %10 : vector<8x32xf32>
    %12 = math.exp %11 : vector<8x32xf32>
    %cst_4 = arith.constant dense<0.000000e+00> : vector<8xf32>
    %13 = vector.multi_reduction <add>, %12, %cst_4 [1] : vector<8x32xf32> to vector<8xf32>
    %14 = vector.shape_cast %13 : vector<8xf32> to vector<8x1xf32>
    %15 = tpu.iota {dimensions = array<i32: 1>} : vector<8x32xi32>
    %16 = vector.broadcast %1 : vector<8x1xi32> to vector<8x32xi32>
    %17 = arith.cmpi eq, %15, %16 : vector<8x32xi32>
    %cst_5 = arith.constant 0.000000e+00 : f32
    %18 = vector.broadcast %cst_5 : f32 to vector<8x32xf32>
    %19 = arith.select %17, %0, %18 : vector<8x32xi1>, vector<8x32xf32>
    %cst_6 = arith.constant dense<0.000000e+00> : vector<8xf32>
    %20 = vector.multi_reduction <add>, %19, %cst_6 [1] : vector<8x32xf32> to vector<8xf32>
    %21 = vector.shape_cast %20 : vector<8xf32> to vector<8x1xf32>
    %cst_7 = arith.constant 0.000000e+00 : f32
    %22 = vector.broadcast %cst_7 : f32 to vector<8x32xf32>
    %23 = arith.select %17, %12, %22 : vector<8x32xi1>, vector<8x32xf32>
    %cst_8 = arith.constant dense<0.000000e+00> : vector<8xf32>
    %24 = vector.multi_reduction <add>, %23, %cst_8 [1] : vector<8x32xf32> to vector<8xf32>
    %25 = vector.shape_cast %24 : vector<8xf32> to vector<8x1xf32>
    %26 = math.log %14 : vector<8x1xf32>
    %27 = arith.addf %26, %9 : vector<8x1xf32>
    %28 = arith.subf %27, %21 : vector<8x1xf32>
    %29 = arith.divf %25, %14 : vector<8x1xf32>
    %cst_9 = arith.constant 1.000000e+00 : f32
    %30 = vector.broadcast %cst_9 : f32 to vector<8x1xf32>
    %31 = arith.subf %30, %29 : vector<8x1xf32>
    %32 = arith.mulf %31, %31 : vector<8x1xf32>
    %33 = arith.mulf %32, %28 : vector<8x1xf32>
    %cst_10 = arith.constant 0.000000e+00 : f32
    %34 = vector.broadcast %cst_10 : f32 to vector<8x1xf32>
    %35 = arith.select %7, %33, %34 : vector<8x1xi1>, vector<8x1xf32>
    %36 = vector.shape_cast %35 : vector<8x1xf32> to vector<1x8x1xf32>
    %cst_11 = arith.constant dense<0.000000e+00> : vector<1xf32>
    %37 = vector.multi_reduction <add>, %36, %cst_11 [1, 2] : vector<1x8x1xf32> to vector<1xf32>
    %38 = vector.shape_cast %37 : vector<1xf32> to vector<1x1x1xf32>
    %39 = vector.extract %38[0, 0, 0] : f32 from vector<1x1x1xf32>
    %40 = vector.broadcast %39 : f32 to vector<1x8x128xf32>
    %c0_12 = arith.constant 0 : index
    %c0_13 = arith.constant 0 : index
    %c0_14 = arith.constant 0 : index
    %41 = vector.load %arg3[%c0_12, %c0_13, %c0_14] : memref<1x8x128xf32, #tpu.memory_space<vmem>>, vector<1x8x128xf32>
    tpu.vector_store %arg3[%c0_12, %c0_13, %c0_14], %40 {strides = array<i32>} : memref<1x8x128xf32, #tpu.memory_space<vmem>>, vector<1x8x128xf32>,
    return
  }
  func.func @transform_0(%arg0: i32) -> (i32, i32) {
    %c0_i32 = arith.constant 0 : i32
    %c0_i32_0 = arith.constant 0 : i32
    return %arg0, %c0_i32 : i32, i32
  }
  func.func @transform_1(%arg0: i32) -> (i32, i32) {
    %c0_i32 = arith.constant 0 : i32
    %c0_i32_0 = arith.constant 0 : i32
    return %arg0, %c0_i32 : i32, i32
  }
  func.func @transform_2(%arg0: i32) -> (i32, i32, i32) {
    %c0_i32 = arith.constant 0 : i32
    %c0_i32_0 = arith.constant 0 : i32
    %c0_i32_1 = arith.constant 0 : i32
    return %arg0, %c0_i32, %c0_i32_0 : i32, i32, i32
  }
}

</mosaic_0001>

<bundles_post_ra>
// kernel: tpu_custom_call.1
= control target key start
LH: loop header
LB: loop body
LE: loop exit
PB: predicated region body
PF: predicated region fallthrough
CT: control target
= control target key end

     0   :  { %vm20_vm0 = vcmask 261120   ;;  %s155_s0 = inlined_call_operand.vmem [shape: f32[8,32], index: 0, kind: input, shape index: {}]   ;;  %s156_s1 = inlined_call_operand.vmem [shape: s32[8,1], index: 1, kind: input, shape index: {}]   ;;  %s157_s2 = inlined_call_operand.hbm [shape: f32[1,8,128], index: 2, kind: output, shape index: {}]  }
   0x1   :  { %v12_v0 = vld [vmem:[%s155_s0] sm:$0xff] }
   0x2   :  { %7 = vsyncpa [#allocation3], 0  ;;  %v21_v1 = vsel %vm20_vm0, %v12_v0, -inf  ;;  %v116_v2 = vmov 0   ;;  %v13_v3 = vld [vmem:[%s156_s1] sm:$0xff]  ;;  %v30_v7 = vlaneseq  ;;  %vm54_vm2 = vcmask 7168  }
   0x3   :  { %85 = vset.pattern.permute.xlu0 %v116_v2  ;;  %s117_s0 = smov [#allocation2]  }
   0x4   :  { %22 = vmax.xlane.f32.xlu0 %v21_v1  ;;  %v31_v8 = vand.u32 127, %v30_v7  ;;  %s73_s1 = sshll.u32 %s117_s0, 4  ;;  %s74_s1 = int_to_ptr.vmem [resolvable:$true] %s73_s1 }
   0x5   :  { %s92_s14 = scalar_lea.vmem %s74_s1, 128  ;;  %p97_p1 = scmp.lt.s32.totalorder %s74_s1, %s74_s1 }
   0x6   :  { %p93_p0 = scmp.ne.s32.totalorder %s74_s1, %s92_s14  ;;  %p98_p2 = scmp.lt.s32.totalorder %s92_s14, %s92_s14 }
   0x8   :  { %p99_p3 = por %p98_p2, %p97_p1 }
   0xa   :  { %p100_p4 = pnand %p99_p3, %p93_p0 }
  0x1a   :  { %33 = vperm.xlu0 %85, %v13_v3  }
  0x91   :  { %v23_v4 = vpop.xlane.xlu0 %22 }
  0x92   :  { %v24_v5 = vsub.f32 %v12_v0, %v23_v4 }
  0x94   :  { %v25_v6 = vmul.f32 1.442695, %v24_v5 }
  0x96   :  { %86 = vpow2.f32 %v25_v6 }
  0x99   :  { %v34_v9 = vpop.permute.xlu0 %33 }
  0x9a   :  { %vm35_vm1 = vcmp.eq.s32.totalorder %v31_v8, %v34_v9 }
  0x9b   :  { %v36_v13 = vsel %vm35_vm1, %v12_v0, 0.0 }
  0x9c   :  { %v37_v15 = vsel %vm20_vm0, %v36_v13, 0.0 }
  0xa0   :  { %v87_v10 = vpop.eup %86 }
  0xa1   :  { %v27_v11 = vsel %vm20_vm0, %v87_v10, 0.0  ;;  %v40_v12 = vsel %vm35_vm1, %v87_v10, 0.0 }
  0xa2   :  { %28 = vadd.xlane.f32.xlu1 %v27_v11  ;;  %v41_v14 = vsel %vm20_vm0, %v40_v12, 0.0 }
  0xa6   :  { %42 = vadd.xlane.f32.xlu1 %v41_v14 }
  0xaa   :  { %38 = vadd.xlane.f32.xlu1 %v37_v15 }
 0x12f   :  { %v29_v16 = vpop.xlane.xlu1 %28 }
 0x130   :  { %88 = vlog2.f32 %v29_v16 }
 0x131   :  { %90 = vrcp.f32 %v29_v16 }
 0x133   :  { %v43_v18 = vpop.xlane.xlu1 %42 }
 0x137   :  { %v39_v24 = vpop.xlane.xlu1 %38 }
 0x13a   :  { %v89_v17 = vpop.eup %88 }
 0x13b   :  { %v91_v19 = vpop.eup %90  ;;  %v45_v20 = vmul.f32 0.6931472, %v89_v17 }
 0x13c   :  { %v49_v21 = vmul.f32 %v91_v19, %v43_v18 }
 0x13d   :  { %v46_v22 = vadd.f32 %v45_v20, %v23_v4 }
 0x13e   :  { %v50_v23 = vsub.f32 1.0, %v49_v21 }
 0x13f   :  { %v47_v25 = vsub.f32 %v46_v22, %v39_v24 }
 0x140   :  { %v51_v26 = vmul.f32 %v50_v23, %v50_v23 }
 0x142   :  { %v52_v27 = vmul.f32 %v51_v26, %v47_v25 }
 0x144   :  { %v55_v28 = vsel %vm54_vm2, %v52_v27, 0.0 }
 0x145   :  { %56 = vadd.xlane.f32.xlu1 %v55_v28 }
 0x1d2   :  { %v57_v29 = vpop.xlane.xlu1 %56 }
 0x1d3   :  { %v58_v30 = vrot.slane %v57_v29, 4 }
 0x1d5   :  { %v59_v31 = vadd.f32 %v58_v30, %v57_v29 }
 0x1d7   :  { %v60_v32 = vrot.slane %v59_v31, 2 }
 0x1d9   :  { %v61_v33 = vadd.f32 %v60_v32, %v59_v31 }
 0x1db   :  { %v62_v34 = vrot.slane %v61_v33, 1 }
 0x1dd   :  { %v63_v35 = vadd.f32 %v62_v34, %v61_v33 }
 0x1df   :  { %81 = vpush %v63_v35 }
 0x210   :  { %s82_s13 = spop %81 }
 0x211   :  { %v65_v36 = vstv %s82_s13 }
 0x212   :  { %66 = vst [vmem:[#allocation2] sm:$0xff] %v65_v36 }
 0x213   :  { %103 = shalt.err (!%p100_p4)
}
 0x214   :  { %s104_s17 = scalar_lea.hbm %s157_s2, 128 }
 0x215   :  { %p105_p5 = scmp.ne.s32.totalorder %s157_s2, %s104_s17  ;;  %p108_p6 = scmp.lt.u32.totalorder %s104_s17, %s157_s2 }
 0x217   :  { %p110_p7 = pnand %p108_p6, %p105_p5 }
 0x219   :  { %113 = shalt.err (!%p110_p7)
}
 0x21a   :  { %76 = dma.vmem_to_hbm [thread:$0]  %s74_s1, 128, %s157_s2, [#allocation3]  }
 0x21b   :  { %114 = dma.done.wait [#allocation3], 128  }
 0x21c   :  { %115 = vsyncadd [#allocation3], 4294967168 }
 0x21d   :  { %80 = vsyncpa [#allocation3], 1 }

</bundles_post_ra>
